<compile_context>
chip_gen: v5e
topology: v5e:2x2
jax: 0.10.0
libtpu: 0.0.40
codegen_flags: <defaults>
</compile_context>

<pallas_src>
import functools

import jax
import jax.numpy as jnp
from jax.experimental import pallas as pl
from jax.experimental.pallas import tpu as pltpu

OUT_LANES = 128  # merged output slab lane width (>= output_size + hidden_size)


def _rnn_kernel(x_ref, h0_ref, w_ref, out_ref, *,
                input_size, hidden_size, output_size):
    """tanh-RNN recurrence + linear head + log-softmax, single packed weight slab.

    Refs (all VMEM, full arrays):
      x_ref:   (L, I)         input sequence (batch = 1 squeezed)
      h0_ref:  (1, H)         initial hidden state
      w_ref:   (rows, H)      packed params, row layout:
                                [0,   I)      : W_ih^T            (I, H)
                                [I,   I+H)    : W_hh^T            (H, H)
                                [I+H, I+2H)   : W_out^T lane-pad  (H, H) (cols O..H-1 zero)
                                 I+2H         : b_ih + b_hh       (1, H)
                                 I+2H+1       : b_out lane-pad    (1, H)
                                rest          : sublane padding
      out_ref: (1, OUT_LANES) lanes [0,O) = log-softmax(logits); lanes [O,O+H) = h_L
    """
    I, H, O = input_size, hidden_size, output_size
    L = x_ref.shape[0]

    # Static-offset views into the single packed slab (one DMA brought it all in).
    wih = w_ref[0:I, :]                               # (I, H)
    whh = w_ref[I:I + H, :]                           # (H, H)
    wout = w_ref[I + H:I + 2 * H, :]                  # (H, H)  lanes >= O are zero
    b = w_ref[I + 2 * H:I + 2 * H + 1, :]             # (1, H)  = b_ih + b_hh
    bout = w_ref[I + 2 * H + 1:I + 2 * H + 2, :]      # (1, H)  lanes >= O are zero

    # Hoisted, h-independent input projection: one (L, I) @ (I, H) matmul + bias,
    # taken off the serial recurrence critical path.
    xp = jnp.dot(x_ref[...], wih, preferred_element_type=jnp.float32) + b  # (L, H)

    # Fully unrolled recurrence (L is a static Python int inside the kernel).
    # Per step: one (1, H) @ (H, H) MXU matmul + VPU add + EUP tanh.
    h = h0_ref[...]                                   # (1, H)
    for t in range(L):
        pre = xp[t:t + 1, :] + jnp.dot(h, whh, preferred_element_type=jnp.float32)
        h = jnp.tanh(pre)

    # Linear head + numerically stable log-softmax (padding lanes sliced away
    # before the reduction, so they never enter max/logsumexp).
    logits = jnp.dot(h, wout, preferred_element_type=jnp.float32) + bout   # (1, H)
    logits = logits[:, :O]                                                 # (1, O)
    m = jnp.max(logits, axis=-1, keepdims=True)
    shifted = logits - m
    lse = jnp.log(jnp.sum(jnp.exp(shifted), axis=-1, keepdims=True))
    logp = shifted - lse                                                   # (1, O)

    # Single lane-dense store: [logp | h | zero padding] -> (1, OUT_LANES).
    pad = jnp.zeros((1, out_ref.shape[1] - O - H), jnp.float32)
    out_ref[...] = jnp.concatenate([logp, h, pad], axis=-1)


def pack_params(params, input_size, hidden_size, output_size):
    """One-time packing of all parameters into a single sublane-padded f32 slab."""
    wih_t, whh_t, bih, bhh, wout_t, bout = params
    I, H, O = input_size, hidden_size, output_size
    assert O <= H, "packing assumes output_size <= hidden_size (lane width = H)"
    wout_pad = jnp.zeros((H, H), jnp.float32).at[:, :O].set(wout_t)
    b_row = (bih + bhh).reshape(1, H)
    bout_row = jnp.zeros((1, H), jnp.float32).at[0, :O].set(bout)
    rows = I + 2 * H + 2
    rows_padded = ((rows + 7) // 8) * 8
    tail = jnp.zeros((rows_padded - rows, H), jnp.float32)
    return jnp.concatenate([wih_t, whh_t, wout_pad, b_row, bout_row, tail], axis=0)


def rnn_forward(x, hidden, packed_w, *, input_size, hidden_size, output_size):
    """Mirror of RNN.forward: returns (log_softmax(linear(rr[-1])), hn).

    x:        (seq_len, input_size)   (PyTorch `input` before unsqueeze(1))
    hidden:   (num_layers=1, 1, hidden_size)
    packed_w: slab from pack_params() (built once, reused every call)
    """
    L = x.shape[0]
    I, H, O = input_size, hidden_size, output_size
    h0 = hidden[0]                                    # (1, H)

    kernel = functools.partial(_rnn_kernel, input_size=I, hidden_size=H,
                               output_size=O)
    vmem = pl.BlockSpec(memory_space=pltpu.MemorySpace.VMEM)
    cost = pl.CostEstimate(
        flops=2 * (L * I * H + L * H * H + H * H),
        transcendentals=L * H + O,
        bytes_accessed=4 * (x.size + h0.size + packed_w.size + OUT_LANES),
    )

    out = pl.pallas_call(
        kernel,
        out_shape=jax.ShapeDtypeStruct((1, OUT_LANES), jnp.float32),
        in_specs=[vmem, vmem, vmem],
        out_specs=vmem,
        cost_estimate=cost,
    )(x, h0, packed_w)

    logp = out[:, :O]
    hn = out[:, O:O + H].reshape(1, 1, H)
    return logp, hn


def init_params(key, input_size, hidden_size, output_size):
    k = jax.random.split(key, 6)
    s = 1.0 / jnp.sqrt(hidden_size)
    wih_t = jax.random.uniform(k[0], (input_size, hidden_size), jnp.float32, -s, s)
    whh_t = jax.random.uniform(k[1], (hidden_size, hidden_size), jnp.float32, -s, s)
    bih = jax.random.uniform(k[2], (hidden_size,), jnp.float32, -s, s)
    bhh = jax.random.uniform(k[3], (hidden_size,), jnp.float32, -s, s)
    wout_t = jax.random.uniform(k[4], (hidden_size, output_size), jnp.float32, -s, s)
    bout = jax.random.uniform(k[5], (output_size,), jnp.float32, -s, s)
    return (wih_t, whh_t, bih, bhh, wout_t, bout)


def _ref_forward(x, hidden, params):
    """Pure-JAX reference matching torch nn.RNN(tanh) + Linear + LogSoftmax."""
    wih_t, whh_t, bih, bhh, wout_t, bout = params
    h = hidden[0]                                     # (1, H)
    for t in range(x.shape[0]):
        h = jnp.tanh(x[t:t + 1] @ wih_t + bih + h @ whh_t + bhh)
    logits = h @ wout_t + bout
    logp = jax.nn.log_softmax(logits, axis=-1)
    return logp, h.reshape(1, 1, -1)


if __name__ == "__main__":
    seq_len, input_size, hidden_size, output_size = 8, 32, 32, 16
    num_layers = 1

    key = jax.random.PRNGKey(0)
    kx, kp = jax.random.split(key)
    x = jax.random.normal(kx, (seq_len, input_size), jnp.float32)
    hidden = jnp.zeros((num_layers, 1, hidden_size), jnp.float32)   # inithidden()
    params = init_params(kp, input_size, hidden_size, output_size)

    # One-time packing (outside the per-call path).
    packed_w = pack_params(params, input_size, hidden_size, output_size)

    logp, hn = rnn_forward(x, hidden, packed_w,
                           input_size=input_size, hidden_size=hidden_size,
                           output_size=output_size)
    jax.block_until_ready((logp, hn))

    # correctness vs pure-JAX reference + shape/prob sanity checks
    logp_ref, hn_ref = _ref_forward(x, hidden, params)
    assert logp.shape == (1, output_size)
    assert hn.shape == (num_layers, 1, hidden_size)
    assert jnp.allclose(logp, logp_ref, atol=1e-5, rtol=1e-5)
    assert jnp.allclose(hn, hn_ref, atol=1e-5, rtol=1e-5)
    assert jnp.allclose(jnp.sum(jnp.exp(logp)), 1.0, atol=1e-4)
    print("KERNEL_OK")
</pallas_src>

<mosaic_0001>
module attributes {stable_mosaic.version = 11 : i64} {
  func.func @_rnn_kernel(%arg0: memref<8x32xf32, #tpu.memory_space<vmem>>, %arg1: memref<1x32xf32, #tpu.memory_space<vmem>>, %arg2: memref<104x32xf32, #tpu.memory_space<vmem>>, %arg3: memref<1x128xf32, #tpu.memory_space<vmem>>) attributes {dimension_semantics = [], scalar_prefetch = 0 : i64, scratch_operands = 0 : i64, tpu.core_type = #tpu.core_type<tc>} {
    %c0 = arith.constant 0 : index
    %c0_0 = arith.constant 0 : index
    %0 = vector.load %arg2[%c0, %c0_0] : memref<104x32xf32, #tpu.memory_space<vmem>>, vector<32x32xf32>
    %c32 = arith.constant 32 : index
    %c0_1 = arith.constant 0 : index
    %1 = vector.load %arg2[%c32, %c0_1] : memref<104x32xf32, #tpu.memory_space<vmem>>, vector<32x32xf32>
    %c64 = arith.constant 64 : index
    %c0_2 = arith.constant 0 : index
    %2 = vector.load %arg2[%c64, %c0_2] : memref<104x32xf32, #tpu.memory_space<vmem>>, vector<32x32xf32>
    %c96 = arith.constant 96 : index
    %c0_3 = arith.constant 0 : index
    %3 = vector.load %arg2[%c96, %c0_3] : memref<104x32xf32, #tpu.memory_space<vmem>>, vector<1x32xf32>
    %c97 = arith.constant 97 : index
    %c0_4 = arith.constant 0 : index
    %4 = vector.load %arg2[%c97, %c0_4] : memref<104x32xf32, #tpu.memory_space<vmem>>, vector<1x32xf32>
    %c0_5 = arith.constant 0 : index
    %c0_6 = arith.constant 0 : index
    %5 = vector.load %arg0[%c0_5, %c0_6] : memref<8x32xf32, #tpu.memory_space<vmem>>, vector<8x32xf32>
    %cst = arith.constant dense<0.000000e+00> : vector<8x32xf32>
    %6 = tpu.matmul %5, %0, %cst {dimension_numbers = #tpu.dot_dimension_numbers<[1], [0], [0], [1], [0, 0, 1, 1], [], []>} : vector<8x32xf32>, vector<32x32xf32>, vector<8x32xf32> -> vector<8x32xf32>
    %7 = vector.broadcast %3 : vector<1x32xf32> to vector<8x32xf32>
    %8 = arith.addf %6, %7 : vector<8x32xf32>
    %c0_7 = arith.constant 0 : index
    %c0_8 = arith.constant 0 : index
    %9 = vector.load %arg1[%c0_7, %c0_8] : memref<1x32xf32, #tpu.memory_space<vmem>>, vector<1x32xf32>
    %10 = vector.extract_strided_slice %8 {offsets = [0, 0], sizes = [1, 32], strides = [1, 1]} : vector<8x32xf32> to vector<1x32xf32>
    %cst_9 = arith.constant dense<0.000000e+00> : vector<1x32xf32>
    %11 = tpu.matmul %9, %1, %cst_9 {dimension_numbers = #tpu.dot_dimension_numbers<[1], [0], [0], [1], [0, 0, 1, 1], [], []>} : vector<1x32xf32>, vector<32x32xf32>, vector<1x32xf32> -> vector<1x32xf32>
    %12 = arith.addf %10, %11 : vector<1x32xf32>
    %13 = math.tanh %12 : vector<1x32xf32>
    %14 = vector.extract_strided_slice %8 {offsets = [1, 0], sizes = [1, 32], strides = [1, 1]} : vector<8x32xf32> to vector<1x32xf32>
    %cst_10 = arith.constant dense<0.000000e+00> : vector<1x32xf32>
    %15 = tpu.matmul %13, %1, %cst_10 {dimension_numbers = #tpu.dot_dimension_numbers<[1], [0], [0], [1], [0, 0, 1, 1], [], []>} : vector<1x32xf32>, vector<32x32xf32>, vector<1x32xf32> -> vector<1x32xf32>
    %16 = arith.addf %14, %15 : vector<1x32xf32>
    %17 = math.tanh %16 : vector<1x32xf32>
    %18 = vector.extract_strided_slice %8 {offsets = [2, 0], sizes = [1, 32], strides = [1, 1]} : vector<8x32xf32> to vector<1x32xf32>
    %cst_11 = arith.constant dense<0.000000e+00> : vector<1x32xf32>
    %19 = tpu.matmul %17, %1, %cst_11 {dimension_numbers = #tpu.dot_dimension_numbers<[1], [0], [0], [1], [0, 0, 1, 1], [], []>} : vector<1x32xf32>, vector<32x32xf32>, vector<1x32xf32> -> vector<1x32xf32>
    %20 = arith.addf %18, %19 : vector<1x32xf32>
    %21 = math.tanh %20 : vector<1x32xf32>
    %22 = vector.extract_strided_slice %8 {offsets = [3, 0], sizes = [1, 32], strides = [1, 1]} : vector<8x32xf32> to vector<1x32xf32>
    %cst_12 = arith.constant dense<0.000000e+00> : vector<1x32xf32>
    %23 = tpu.matmul %21, %1, %cst_12 {dimension_numbers = #tpu.dot_dimension_numbers<[1], [0], [0], [1], [0, 0, 1, 1], [], []>} : vector<1x32xf32>, vector<32x32xf32>, vector<1x32xf32> -> vector<1x32xf32>
    %24 = arith.addf %22, %23 : vector<1x32xf32>
    %25 = math.tanh %24 : vector<1x32xf32>
    %26 = vector.extract_strided_slice %8 {offsets = [4, 0], sizes = [1, 32], strides = [1, 1]} : vector<8x32xf32> to vector<1x32xf32>
    %cst_13 = arith.constant dense<0.000000e+00> : vector<1x32xf32>
    %27 = tpu.matmul %25, %1, %cst_13 {dimension_numbers = #tpu.dot_dimension_numbers<[1], [0], [0], [1], [0, 0, 1, 1], [], []>} : vector<1x32xf32>, vector<32x32xf32>, vector<1x32xf32> -> vector<1x32xf32>
    %28 = arith.addf %26, %27 : vector<1x32xf32>
    %29 = math.tanh %28 : vector<1x32xf32>
    %30 = vector.extract_strided_slice %8 {offsets = [5, 0], sizes = [1, 32], strides = [1, 1]} : vector<8x32xf32> to vector<1x32xf32>
    %cst_14 = arith.constant dense<0.000000e+00> : vector<1x32xf32>
    %31 = tpu.matmul %29, %1, %cst_14 {dimension_numbers = #tpu.dot_dimension_numbers<[1], [0], [0], [1], [0, 0, 1, 1], [], []>} : vector<1x32xf32>, vector<32x32xf32>, vector<1x32xf32> -> vector<1x32xf32>
    %32 = arith.addf %30, %31 : vector<1x32xf32>
    %33 = math.tanh %32 : vector<1x32xf32>
    %34 = vector.extract_strided_slice %8 {offsets = [6, 0], sizes = [1, 32], strides = [1, 1]} : vector<8x32xf32> to vector<1x32xf32>
    %cst_15 = arith.constant dense<0.000000e+00> : vector<1x32xf32>
    %35 = tpu.matmul %33, %1, %cst_15 {dimension_numbers = #tpu.dot_dimension_numbers<[1], [0], [0], [1], [0, 0, 1, 1], [], []>} : vector<1x32xf32>, vector<32x32xf32>, vector<1x32xf32> -> vector<1x32xf32>
    %36 = arith.addf %34, %35 : vector<1x32xf32>
    %37 = math.tanh %36 : vector<1x32xf32>
    %38 = vector.extract_strided_slice %8 {offsets = [7, 0], sizes = [1, 32], strides = [1, 1]} : vector<8x32xf32> to vector<1x32xf32>
    %cst_16 = arith.constant dense<0.000000e+00> : vector<1x32xf32>
    %39 = tpu.matmul %37, %1, %cst_16 {dimension_numbers = #tpu.dot_dimension_numbers<[1], [0], [0], [1], [0, 0, 1, 1], [], []>} : vector<1x32xf32>, vector<32x32xf32>, vector<1x32xf32> -> vector<1x32xf32>
    %40 = arith.addf %38, %39 : vector<1x32xf32>
    %41 = math.tanh %40 : vector<1x32xf32>
    %cst_17 = arith.constant dense<0.000000e+00> : vector<1x32xf32>
    %42 = tpu.matmul %41, %2, %cst_17 {dimension_numbers = #tpu.dot_dimension_numbers<[1], [0], [0], [1], [0, 0, 1, 1], [], []>} : vector<1x32xf32>, vector<32x32xf32>, vector<1x32xf32> -> vector<1x32xf32>
    %43 = arith.addf %42, %4 : vector<1x32xf32>
    %44 = vector.extract_strided_slice %43 {offsets = [0, 0], sizes = [1, 16], strides = [1, 1]} : vector<1x32xf32> to vector<1x16xf32>
    %cst_18 = arith.constant dense<0xFF800000> : vector<1xf32>
    %45 = vector.multi_reduction <maximumf>, %44, %cst_18 [1] : vector<1x16xf32> to vector<1xf32>
    %46 = vector.shape_cast %45 : vector<1xf32> to vector<1x1xf32>
    %47 = vector.broadcast %46 : vector<1x1xf32> to vector<1x16xf32>
    %48 = arith.subf %44, %47 : vector<1x16xf32>
    %49 = math.exp %48 : vector<1x16xf32>
    %cst_19 = arith.constant dense<0.000000e+00> : vector<1xf32>
    %50 = vector.multi_reduction <add>, %49, %cst_19 [1] : vector<1x16xf32> to vector<1xf32>
    %51 = vector.shape_cast %50 : vector<1xf32> to vector<1x1xf32>
    %52 = math.log %51 : vector<1x1xf32>
    %53 = vector.broadcast %52 : vector<1x1xf32> to vector<1x16xf32>
    %54 = arith.subf %48, %53 : vector<1x16xf32>
    %cst_20 = arith.constant 0.000000e+00 : f32
    %55 = vector.broadcast %cst_20 : f32 to vector<1x80xf32>
    %56 = tpu.concatenate %54, %41, %55 in 1 : vector<1x16xf32>, vector<1x32xf32>, vector<1x80xf32> -> vector<1x128xf32>
    %c0_21 = arith.constant 0 : index
    %c0_22 = arith.constant 0 : index
    %57 = vector.load %arg3[%c0_21, %c0_22] : memref<1x128xf32, #tpu.memory_space<vmem>>, vector<1x128xf32>
    tpu.vector_store %arg3[%c0_21, %c0_22], %56 {strides = array<i32>} : memref<1x128xf32, #tpu.memory_space<vmem>>, vector<1x128xf32>,
    return
  }
}

</mosaic_0001>

<bundles_post_ra>
// kernel: tpu_custom_call.1
= control target key start
LH: loop header
LB: loop body
LE: loop exit
PB: predicated region body
PF: predicated region fallthrough
CT: control target
= control target key end

     0   :  { %s486_s0 = inlined_call_operand.vmem [shape: f32[8,32], index: 0, kind: input, shape index: {}]   ;;  %s487_s1 = inlined_call_operand.vmem [shape: f32[1,32], index: 1, kind: input, shape index: {}]   ;;  %s488_s2 = inlined_call_operand.vmem [shape: f32[104,32], index: 2, kind: input, shape index: {}]   ;;  %s489_s3 = inlined_call_operand.hbm [shape: f32[1,128], index: 3, kind: output, shape index: {}]  }
   0x1   :  { %v18_v0 = vld [vmem:[%s488_s2 + $0x18] sm:$0xff]  ;;  %v17_v1 = vld [vmem:[%s488_s2 + $0x10] sm:$0xff]  ;;  %v16_v4 = vld [vmem:[%s488_s2 + $0x8] sm:$0xff] }
   0x2   :  { %v22_v2 = vld [vmem:[%s488_s2 + $0x38] sm:$0xff]  ;;  %47 = vmatpush.msra.mxu0 %v18_v0  ;;  %v21_v3 = vld [vmem:[%s488_s2 + $0x30] sm:$0xff]  ;;  %v20_v5 = vld [vmem:[%s488_s2 + $0x28] sm:$0xff] }
   0x3   :  { %71 = vmatpush.msra.mxu1 %v22_v2  ;;  %96 = vmatpush.msra.mxu2 %v22_v2  ;;  %v15_v6 = vld [vmem:[%s488_s2] sm:$0xff] }
   0x4   :  { %125 = vmatpush.msra.mxu3 %v22_v2  ;;  %48 = vmatpush.msra.mxu0 %v17_v1  ;;  %v19_v7 = vld [vmem:[%s488_s2 + $0x20] sm:$0xff] }
   0x5   :  { %72 = vmatpush.msra.mxu1 %v21_v3  ;;  %97 = vmatpush.msra.mxu2 %v21_v3 }
   0x6   :  { %126 = vmatpush.msra.mxu3 %v21_v3 }
   0x7   :  { %8 = vsyncpa [#allocation3], 0  ;;  %49 = vmatpush.msra.mxu0 %v16_v4  ;;  %73 = vmatpush.msra.mxu1 %v20_v5  ;;  %v29_v8 = vld [vmem:[%s486_s0] sm:$0xff]  ;;  %vm31_vm0 = vcmask 261120   ;;  %v26_v46 = vld [vmem:[%s488_s2 + $0x58] sm:$0xff]  ;;  %s403_s13 = smov 16  }
   0x8   :  { %v55_v9 = vld [vmem:[%s487_s1] sm:$0x1]  ;;  %98 = vmatpush.msra.mxu2 %v20_v5  ;;  %127 = vmatpush.msra.mxu3 %v20_v5  ;;  %v25_v47 = vld [vmem:[%s488_s2 + $0x50] sm:$0xff]  ;;  %v24_v48 = vld [vmem:[%s488_s2 + $0x48] sm:$0xff]  ;;  %vm307_vm1 = vcmask 122880   ;;  %vm323_vm2 = vcmask 130048  }
   0x9   :  { %50 = vmatpush.msra.mxu0 %v15_v6  ;;  %74 = vmatpush.msra.mxu1 %v19_v7  ;;  %v356_v10 = vld [vmem:[%s488_s2 + $0x60] ss:$0 sm:$0xff]  ;;  %v28_v55 = vld [vmem:[%s488_s2 + $0x61] sm:$0x1]  ;;  %s404_s16 = smov [#allocation2]   ;;  %s335_s19 = sshll.u32 %s489_s3, 4  ;;  %s336_s19 = int_to_ptr.hbm [resolvable:$true] %s335_s19 }
   0xa   :  { %344 = vmatmul.msk.f32.vlgmr.msra.gmra.mxu0 %vm31_vm0, %v29_v8  ;;  %345 = vmatmul.msk.f32.vlgmr.msra.gmra.mxu1 %vm31_vm0, %v55_v9  ;;  %v23_v49 = vld [vmem:[%s488_s2 + $0x40] sm:$0xff]  ;;  %s333_s17 = sshll.u32 %s404_s16, 4  ;;  %vm325_vm3 = vcmask 392192   ;;  %s334_s17 = int_to_ptr.vmem [resolvable:$true] %s333_s17 }
   0xb   :  { %99 = vmatpush.msra.mxu2 %v19_v7  ;;  %128 = vmatpush.msra.mxu3 %v19_v7 }
   0xc   :  { %154 = vmatpush.msrb.mxu0 %v22_v2  ;;  %183 = vmatpush.msrb.mxu1 %v22_v2 }
   0xd   :  { %212 = vmatpush.msrb.mxu2 %v22_v2  ;;  %241 = vmatpush.msrb.mxu3 %v22_v2 }
   0xe   :  { %155 = vmatpush.msrb.mxu0 %v21_v3  ;;  %184 = vmatpush.msrb.mxu1 %v21_v3 }
   0xf   :  { %213 = vmatpush.msrb.mxu2 %v21_v3  ;;  %242 = vmatpush.msrb.mxu3 %v21_v3 }
  0x10   :  { %156 = vmatpush.msrb.mxu0 %v20_v5  ;;  %185 = vmatpush.msrb.mxu1 %v20_v5 }
  0x11   :  { %214 = vmatpush.msrb.mxu2 %v20_v5  ;;  %243 = vmatpush.msrb.mxu3 %v20_v5 }
  0x12   :  { %157 = vmatpush.msrb.mxu0 %v19_v7  ;;  %186 = vmatpush.msrb.mxu1 %v19_v7 }
  0x13   :  { %215 = vmatpush.msrb.mxu2 %v19_v7  ;;  %244 = vmatpush.msrb.mxu3 %v19_v7 }
  0x14   :  { %270 = vmatpush.msra.mxu0 %v22_v2  ;;  %299 = vmatpush.msra.mxu1 %v26_v46 }
  0x16   :  { %271 = vmatpush.msra.mxu0 %v21_v3  ;;  %300 = vmatpush.msra.mxu1 %v25_v47 }
  0x18   :  { %272 = vmatpush.msra.mxu0 %v20_v5  ;;  %301 = vmatpush.msra.mxu1 %v24_v48 }
  0x1a   :  { %273 = vmatpush.msra.mxu0 %v19_v7  ;;  %302 = vmatpush.msra.mxu1 %v23_v49 }
  0x87   :  { %v52_v11 = vpop.f32.mrf.mxu0  ;;  %v76_v12 = vpop.f32.mrf.mxu1 }
  0x88   :  { %v53_v13 = vadd.f32 %v356_v10, %v52_v11 }
  0x8a   :  { %v79_v14 = vadd.f32 %v76_v12, %v53_v13 }
  0x8c   :  { %357 = vtanh.f32 %v79_v14 }
  0x92   :  { %v358_v15 = vpop.eup %357 }
  0x93   :  { %346 = vmatmul.msk.f32.vlgmr.msra.gmra.mxu2 %vm31_vm0, %v358_v15 }
 0x116   :  { %v101_v16 = vpop.f32.mrf.mxu2 }
 0x117   :  { %v105_v17 = vrot.slane %v101_v16, 7 }
 0x119   :  { %v107_v18 = vadd.f32 %v105_v17, %v53_v13 }
 0x11b   :  { %359 = vtanh.f32 %v107_v18 }
 0x121   :  { %v360_v19 = vpop.eup %359 }
 0x122   :  { %v110_v20 = vrot.slane %v360_v19, 1 }
 0x124   :  { %347 = vmatmul.msk.f32.vlgmr.msra.gmra.mxu3 %vm31_vm0, %v110_v20 }
 0x1a7   :  { %v130_v21 = vpop.f32.mrf.mxu3 }
 0x1a8   :  { %v134_v22 = vrot.slane %v130_v21, 6 }
 0x1aa   :  { %v136_v23 = vadd.f32 %v134_v22, %v53_v13 }
 0x1ac   :  { %361 = vtanh.f32 %v136_v23 }
 0x1b2   :  { %v362_v24 = vpop.eup %361 }
 0x1b3   :  { %v139_v25 = vrot.slane %v362_v24, 2 }
 0x1b5   :  { %348 = vmatmul.msk.f32.vlgmr.msrb.gmra.mxu0 %vm31_vm0, %v139_v25 }
 0x232   :  { %v159_v26 = vpop.f32.mrf.mxu0 }
 0x233   :  { %v163_v27 = vrot.slane %v159_v26, 5 }
 0x235   :  { %v165_v28 = vadd.f32 %v163_v27, %v53_v13 }
 0x237   :  { %363 = vtanh.f32 %v165_v28 }
 0x23d   :  { %v364_v29 = vpop.eup %363 }
 0x23e   :  { %v168_v30 = vrot.slane %v364_v29, 3 }
 0x240   :  { %349 = vmatmul.msk.f32.vlgmr.msrb.gmra.mxu1 %vm31_vm0, %v168_v30 }
 0x2bd   :  { %v188_v31 = vpop.f32.mrf.mxu1 }
 0x2be   :  { %v192_v32 = vrot.slane %v188_v31, 4 }
 0x2c0   :  { %v194_v33 = vadd.f32 %v192_v32, %v53_v13 }
 0x2c2   :  { %365 = vtanh.f32 %v194_v33 }
 0x2c8   :  { %v366_v34 = vpop.eup %365 }
 0x2c9   :  { %v197_v35 = vrot.slane %v366_v34, 4 }
 0x2cb   :  { %350 = vmatmul.msk.f32.vlgmr.msrb.gmra.mxu2 %vm31_vm0, %v197_v35 }
 0x34e   :  { %v217_v36 = vpop.f32.mrf.mxu2 }
 0x34f   :  { %v221_v37 = vrot.slane %v217_v36, 3 }
 0x351   :  { %v223_v38 = vadd.f32 %v221_v37, %v53_v13 }
 0x353   :  { %367 = vtanh.f32 %v223_v38 }
 0x359   :  { %v368_v39 = vpop.eup %367 }
 0x35a   :  { %v226_v40 = vrot.slane %v368_v39, 5 }
 0x35c   :  { %351 = vmatmul.msk.f32.vlgmr.msrb.gmra.mxu3 %vm31_vm0, %v226_v40 }
 0x3df   :  { %v246_v41 = vpop.f32.mrf.mxu3 }
 0x3e0   :  { %v250_v42 = vrot.slane %v246_v41, 2 }
 0x3e2   :  { %v252_v43 = vadd.f32 %v250_v42, %v53_v13 }
 0x3e4   :  { %369 = vtanh.f32 %v252_v43 }
 0x3ea   :  { %v370_v44 = vpop.eup %369 }
 0x3eb   :  { %v255_v45 = vrot.slane %v370_v44, 6 }
 0x3ed   :  { %352 = vmatmul.msk.f32.vlgmr.msra.gmra.mxu0 %vm31_vm0, %v255_v45 }
 0x46a   :  { %v275_v50 = vpop.f32.mrf.mxu0 }
 0x46b   :  { %v279_v51 = vrot.slane %v275_v50, 1 }
 0x46d   :  { %v281_v52 = vadd.f32 %v279_v51, %v53_v13 }
 0x46f   :  { %371 = vtanh.f32 %v281_v52 }
 0x475   :  { %v372_v53 = vpop.eup %371 }
 0x476   :  { %v284_v54 = vrot.slane %v372_v53, 7 }
 0x478   :  { %320 = vrot.lane.b32.xlu1 %v284_v54, %s403_s13  ;;  %353 = vmatmul.msk.f32.vlgmr.msra.gmra.mxu1 %vm31_vm0, %v284_v54 }
 0x4ea   :  { %v321_v4 = vpop.permute.xlu1 %320 }
 0x4f5   :  { %v304_v56 = vpop.f32.mrf.mxu1 }
 0x4f6   :  { %v305_v57 = vadd.f32 %v304_v56, %v28_v55 }
 0x4f8   :  { %v308_v58 = vsel %vm307_vm1, %v305_v57, -inf }
 0x4f9   :  { %309 = vmax.xlane.f32.xlu0 %v308_v58 }
 0x56c   :  { %v310_v59 = vpop.xlane.xlu0 %309 }
 0x56d   :  { %v311_v60 = vsub.f32 %v305_v57, %v310_v59 }
 0x56f   :  { %v312_v61 = vmul.f32 1.442695, %v311_v60 }
 0x571   :  { %373 = vpow2.f32 %v312_v61 }
 0x577   :  { %v374_v62 = vpop.eup %373 }
 0x578   :  { %v314_v63 = vsel %vm307_vm1, %v374_v62, 0.0 }
 0x579   :  { %315 = vadd.xlane.f32.xlu0 %v314_v63 }
 0x5ec   :  { %v316_v0 = vpop.xlane.xlu0 %315 }
 0x5ed   :  { %375 = vlog2.f32 %v316_v0 }
 0x5f3   :  { %v376_v1 = vpop.eup %375 }
 0x5f4   :  { %v318_v2 = vmul.f32 0.6931472, %v376_v1 }
 0x5f6   :  { %v319_v3 = vsub.f32 %v311_v60, %v318_v2 }
 0x5f8   :  { %v324_v5 = vsel %vm323_vm2, %v319_v3, %v321_v4 }
 0x5f9   :  { %v326_v6 = vsel %vm325_vm3, %v324_v5, 0.0 }
 0x5fa   :  { %327 = vst [vmem:[#allocation2] sm:$0x1] %v326_v6 }
 0x5fb   :  { %338 = dma.vmem_to_hbm [thread:$0]  %s334_s17, 16, %s336_s19, [#allocation3]  }
 0x5fc   :  { %401 = dma.done.wait [#allocation3], 16  }
 0x5fd   :  { %402 = vsyncadd [#allocation3], 4294967280 }
 0x5fe   :  { %343 = vsyncpa [#allocation3], 1 }

</bundles_post_ra>
